<compile_context>
chip_gen: v7x
topology: tpu7x:2x2x1
jax: 0.10.0
libtpu: 0.0.40
codegen_flags: <defaults>
</compile_context>

<pallas_src>
import functools

import jax
import jax.numpy as jnp
from jax.experimental import pallas as pl
from jax.experimental.pallas import tpu as pltpu


# --------------------------------------------------------------------------
# Large-L path: direct HBM->HBM DMA, batch-blocked
# --------------------------------------------------------------------------
def _cls_kernel_dma(cls_ref, x_hbm, o_hbm, cls_vmem, sem, *, bt, B, L, clamp):
    # cls_ref:  (1, 1, H)   VMEM  -- CLS token (fetched once)
    # x_hbm:    (B, L, H)   HBM   -- raw input ref (memory_space=pl.ANY)
    # o_hbm:    (B, L+1, H) HBM   -- raw output ref (memory_space=pl.ANY)
    # cls_vmem: (bt, 1, H)  VMEM  -- CLS replicated across the batch block
    # sem:      (2,) DMA semaphores
    i = pl.program_id(0)
    b0 = i * bt
    if clamp:
        # Possibly-partial last block: re-copy of overlapping rows is idempotent
        # (identical data); the grid axis is "arbitrary" in this case so the
        # overlapping DMA writes are never issued concurrently by two cores.
        b0 = jnp.minimum(b0, B - bt)

    # Replicate the CLS token across the batch block (cheap VPU fill each step;
    # step-invariant guards are unsafe under megacore sharding, so just refill).
    cls_vmem[...] = jnp.broadcast_to(cls_ref[...], cls_vmem.shape)

    # Bulk copy: x[b0:b0+bt] -> out[b0:b0+bt, 1:L+1, :]  (HBM -> HBM, strided dst).
    body_cp = pltpu.make_async_copy(
        x_hbm.at[pl.ds(b0, bt)],
        o_hbm.at[pl.ds(b0, bt), pl.ds(1, L), :],
        sem.at[0],
    )
    # CLS rows: one strided DMA writes row 0 of every batch in the block.
    cls_cp = pltpu.make_async_copy(
        cls_vmem,
        o_hbm.at[pl.ds(b0, bt), pl.ds(0, 1), :],
        sem.at[1],
    )
    body_cp.start()
    cls_cp.start()
    body_cp.wait()
    cls_cp.wait()


def _add_cls_dma(x3, cls3, *, target_block_bytes, cls_scratch_bytes=2 * 1024 * 1024):
    B, L, H = x3.shape
    itemsize = jnp.dtype(x3.dtype).itemsize
    per_batch = max(L * H * itemsize, 1)

    # Block size: big enough per DMA to amortize per-step issue/wait overhead
    # (the bulk path never touches VMEM); capped so the CLS VMEM scratch stays
    # small and so the grid keeps enough steps for both v7x TensorCores.
    bt = min(
        B,
        max(1, target_block_bytes // per_batch),
        max(1, cls_scratch_bytes // max(H * itemsize, 1)),
    )
    min_steps = min(B, 4)
    if min_steps > 1:
        bt = min(bt, pl.cdiv(B, min_steps))
    bt = max(1, bt)

    # Prefer a bt that divides B (no redundant clamped last block) as long as
    # it does not shrink the block by more than 2x.
    clamp = True
    for cand in range(bt, max(0, bt // 2), -1):
        if B % cand == 0:
            bt = cand
            clamp = False
            break
    grid = pl.cdiv(B, bt)

    kernel = functools.partial(_cls_kernel_dma, bt=bt, B=B, L=L, clamp=clamp)

    return pl.pallas_call(
        kernel,
        out_shape=jax.ShapeDtypeStruct((B, L + 1, H), x3.dtype),
        grid=(grid,),
        in_specs=[
            pl.BlockSpec((1, 1, H), lambda i: (0, 0, 0)),   # CLS -> VMEM, once
            pl.BlockSpec(memory_space=pl.ANY),              # x stays in HBM
        ],
        out_specs=pl.BlockSpec(memory_space=pl.ANY),        # out stays in HBM
        scratch_shapes=[
            pltpu.VMEM((bt, 1, H), x3.dtype),
            pltpu.SemaphoreType.DMA((2,)),
        ],
        compiler_params=pltpu.CompilerParams(
            dimension_semantics=("parallel",) if not clamp else ("arbitrary",),
            has_side_effects=True,
        ),
    )(cls3, x3)


# --------------------------------------------------------------------------
# Small-L fallback: VMEM-staged, contiguous output tiles
# --------------------------------------------------------------------------
def _cls_kernel_vmem(cls_ref, x_ref, o_ref):
    # cls_ref: (1, 1, H), x_ref: (bt, L, H), o_ref: (bt, L+1, H) — all VMEM
    bt, _, H = x_ref.shape
    o_ref[:, 0:1, :] = jnp.broadcast_to(cls_ref[...], (bt, 1, H))
    o_ref[:, 1:, :] = x_ref[...]


def _add_cls_vmem(x3, cls3, *, target_block_bytes=2 * 1024 * 1024):
    B, L, H = x3.shape
    itemsize = jnp.dtype(x3.dtype).itemsize
    per_batch = max((2 * L + 1) * H * itemsize, 1)   # input + output bytes per batch
    bt_max = max(1, min(B, target_block_bytes // per_batch))
    # Largest divisor of B that fits: every block is full-size, no partial tiles.
    bt = 1
    for cand in range(bt_max, 0, -1):
        if B % cand == 0:
            bt = cand
            break
    grid = B // bt

    return pl.pallas_call(
        _cls_kernel_vmem,
        out_shape=jax.ShapeDtypeStruct((B, L + 1, H), x3.dtype),
        grid=(grid,),
        in_specs=[
            pl.BlockSpec((1, 1, H), lambda i: (0, 0, 0)),
            pl.BlockSpec((bt, L, H), lambda i: (i, 0, 0)),
        ],
        out_specs=pl.BlockSpec((bt, L + 1, H), lambda i: (i, 0, 0)),
        compiler_params=pltpu.CompilerParams(
            dimension_semantics=("parallel",),
        ),
    )(cls3, x3)


# --------------------------------------------------------------------------
# Public wrapper
# --------------------------------------------------------------------------
def add_cls(x: jax.Array, cls_embedding: jax.Array,
            *, target_block_bytes: int = 64 * 1024 * 1024,
            small_chunk_bytes: int = 4096) -> jax.Array:
    """Prepend the CLS token along axis -2: (..., L, H) -> (..., L+1, H)."""
    *lead, L, H = x.shape
    lead = tuple(lead)
    x3 = x.reshape((-1, L, H))                   # fold leading dims into one batch axis
    cls3 = cls_embedding.astype(x.dtype).reshape(1, 1, H)
    itemsize = jnp.dtype(x.dtype).itemsize

    if L * H * itemsize <= small_chunk_bytes:
        # Strided-destination bursts would be too small for efficient HBM
        # writes; stage contiguous output tiles through VMEM instead.
        out3 = _add_cls_vmem(x3, cls3)
    else:
        out3 = _add_cls_dma(x3, cls3, target_block_bytes=target_block_bytes)

    return out3.reshape(lead + (L + 1, H))


if __name__ == "__main__":
    key = jax.random.PRNGKey(0)
    k_x, k_cls, k_x2 = jax.random.split(key, 3)

    # ---- Case 1: small shape (exercises the VMEM-staged fallback path) ----
    B, L, H = 2, 8, 32
    x = jax.random.normal(k_x, (B, L, H), dtype=jnp.float32)
    # Deterministic parameter init matching nn.init.uniform_(cls_embedding, -1, 1)
    cls_embedding = jax.random.uniform(k_cls, (H,), dtype=jnp.float32,
                                       minval=-1.0, maxval=1.0)

    out = jax.block_until_ready(add_cls(x, cls_embedding))
    ref = jnp.concatenate(
        [jnp.broadcast_to(cls_embedding, (B, 1, H)), x], axis=-2
    )
    assert out.shape == (B, L + 1, H), out.shape
    assert jnp.allclose(out, ref), "mismatch vs reference (VMEM path)"

    # ---- Case 2: extra leading dim, larger chunk (exercises the HBM->HBM DMA path) ----
    B2, G2, L2, H2 = 2, 3, 16, 128
    x2 = jax.random.normal(k_x2, (B2, G2, L2, H2), dtype=jnp.float32)
    cls2 = jax.random.uniform(k_cls, (H2,), dtype=jnp.float32,
                              minval=-1.0, maxval=1.0)

    out2 = jax.block_until_ready(add_cls(x2, cls2))
    ref2 = jnp.concatenate(
        [jnp.broadcast_to(cls2, (B2, G2, 1, H2)), x2], axis=-2
    )
    assert out2.shape == (B2, G2, L2 + 1, H2), out2.shape
    assert jnp.allclose(out2, ref2), "mismatch vs reference (DMA path)"

    print("KERNEL_OK")
</pallas_src>

<mosaic_0001>
module attributes {stable_mosaic.version = 11 : i64} {
  func.func @_cls_kernel_vmem(%arg0: i32, %arg1: memref<1x1x32xf32, #tpu.memory_space<vmem>>, %arg2: memref<2x8x32xf32, #tpu.memory_space<vmem>>, %arg3: memref<2x9x32xf32, #tpu.memory_space<vmem>>) attributes {dimension_semantics = [#tpu.dimension_semantics<parallel>], iteration_bounds = array<i64: 1>, scalar_prefetch = 0 : i64, scratch_operands = 0 : i64, tpu.core_type = #tpu.core_type<tc>, window_params = [{pipeline_mode = #tpu.pipeline_mode<synchronous>, transform_indices = @transform_0, window_bounds = array<i64: 1, 1, 32>}, {transform_indices = @transform_1, window_bounds = array<i64: 2, 8, 32>}, {transform_indices = @transform_2, window_bounds = array<i64: 2, 9, 32>}]} {
    %c0 = arith.constant 0 : index
    %c0_0 = arith.constant 0 : index
    %c0_1 = arith.constant 0 : index
    %0 = vector.load %arg1[%c0, %c0_0, %c0_1] : memref<1x1x32xf32, #tpu.memory_space<vmem>>, vector<1x1x32xf32>
    %1 = vector.shape_cast %0 : vector<1x1x32xf32> to vector<1x1x32xf32>
    %2 = vector.broadcast %1 : vector<1x1x32xf32> to vector<2x1x32xf32>
    %c0_2 = arith.constant 0 : index
    %c0_3 = arith.constant 0 : index
    %c0_4 = arith.constant 0 : index
    %3 = vector.load %arg3[%c0_2, %c0_3, %c0_4] : memref<2x9x32xf32, #tpu.memory_space<vmem>>, vector<2x1x32xf32>
    tpu.vector_store %arg3[%c0_2, %c0_3, %c0_4], %2 {strides = array<i32>} : memref<2x9x32xf32, #tpu.memory_space<vmem>>, vector<2x1x32xf32>,
    %c0_5 = arith.constant 0 : index
    %c0_6 = arith.constant 0 : index
    %c0_7 = arith.constant 0 : index
    %4 = vector.load %arg2[%c0_5, %c0_6, %c0_7] : memref<2x8x32xf32, #tpu.memory_space<vmem>>, vector<2x8x32xf32>
    %c0_8 = arith.constant 0 : index
    %c1 = arith.constant 1 : index
    %c0_9 = arith.constant 0 : index
    %5 = vector.load %arg3[%c0_8, %c1, %c0_9] : memref<2x9x32xf32, #tpu.memory_space<vmem>>, vector<2x8x32xf32>
    tpu.vector_store %arg3[%c0_8, %c1, %c0_9], %4 {strides = array<i32>} : memref<2x9x32xf32, #tpu.memory_space<vmem>>, vector<2x8x32xf32>,
    return
  }
  func.func @transform_0(%arg0: i32) -> (i32, i32, i32) {
    %c0_i32 = arith.constant 0 : i32
    %c0_i32_0 = arith.constant 0 : i32
    %c0_i32_1 = arith.constant 0 : i32
    %c0_i32_2 = arith.constant 0 : i32
    return %c0_i32, %c0_i32_0, %c0_i32_1 : i32, i32, i32
  }
  func.func @transform_1(%arg0: i32) -> (i32, i32, i32) {
    %c0_i32 = arith.constant 0 : i32
    %c0_i32_0 = arith.constant 0 : i32
    %c0_i32_1 = arith.constant 0 : i32
    return %arg0, %c0_i32, %c0_i32_0 : i32, i32, i32
  }
  func.func @transform_2(%arg0: i32) -> (i32, i32, i32) {
    %c0_i32 = arith.constant 0 : i32
    %c0_i32_0 = arith.constant 0 : i32
    %c0_i32_1 = arith.constant 0 : i32
    return %arg0, %c0_i32, %c0_i32_0 : i32, i32, i32
  }
}

</mosaic_0001>

<bundles_post_ra>
// kernel: tpu_custom_call.1
= control target key start
LH: loop header
LB: loop body
LE: loop exit
PB: predicated region body
PF: predicated region fallthrough
CT: control target
= control target key end

     0   :  { %7 = vsyncpa [#allocation3], 0  ;;  %s166_s0 = inlined_call_operand.hbm [shape: f32[1,1,32], index: 0, kind: input, shape index: {}]   ;;  %s167_s1 = inlined_call_operand.hbm [shape: f32[2,8,32], index: 1, kind: input, shape index: {}]   ;;  %s168_s2 = inlined_call_operand.vmem [shape: f32[2,9,32], index: 2, kind: output, shape index: {}]  }
   0x1   :  { %8 = vsyncpa [#allocation5], 0  ;;  %s104_s9 = smov [#allocation2]   ;;  %s105_s11 = smov [#allocation4]  }
   0x2   :  { %s15_s10 = sshll.u32 %s104_s9, 4  ;;  %s24_s12 = sshll.u32 %s105_s11, 4  ;;  %s16_s10 = int_to_ptr.vmem [resolvable:$true] %s15_s10  ;;  %s123_s12 = int_to_ptr.vmem [resolvable:$true] %s24_s12 }
   0x3   :  { %s56_s15 = scalar_lea.hbm %s166_s0, 16 }
   0x4   :  { %p57_p0 = scmp.ne.s32.totalorder %s166_s0, %s56_s15  ;;  %p60_p1 = scmp.lt.u32.totalorder %s56_s15, %s166_s0 }
   0x6   :  { %p62_p2 = pnand %p60_p1, %p57_p0 }
   0x8   :  { %65 = shalt.err (!%p62_p2)
}
   0x9   :  { %s66_s20 = scalar_lea.vmem %s16_s10, 16  ;;  %s70_s21 = scalar_lea.vmem %s16_s10, 32 }
   0xa   :  { %p67_p3 = scmp.ne.s32.totalorder %s16_s10, %s66_s20  ;;  %p71_p4 = scmp.lt.s32.totalorder %s16_s10, %s16_s10 }
   0xb   :  { %p72_p5 = scmp.lt.s32.totalorder %s70_s21, %s66_s20 }
   0xd   :  { %p73_p6 = por %p72_p5, %p71_p4 }
   0xf   :  { %p74_p7 = pnand %p73_p6, %p67_p3 }
  0x11   :  { %77 = shalt.err (!%p74_p7)
}
  0x12   :  { %18 = dma.hbm_to_vmem [thread:$0]  %s166_s0, 16, %s16_s10, [#allocation3]  }
  0x13   :  { %s78_s26 = scalar_lea.hbm %s167_s1, 256 }
  0x14   :  { %p79_p8 = scmp.ne.s32.totalorder %s167_s1, %s78_s26  ;;  %p82_p9 = scmp.lt.u32.totalorder %s78_s26, %s167_s1 }
  0x16   :  { %p84_p10 = pnand %p82_p9, %p79_p8 }
  0x18   :  { %87 = shalt.err (!%p84_p10)
}
  0x19   :  { %s88_s3 = scalar_lea.vmem %s123_s12, 256  ;;  %p93_p12 = scmp.lt.s32.totalorder %s123_s12, %s123_s12 }
  0x1a   :  { %p89_p11 = scmp.ne.s32.totalorder %s123_s12, %s88_s3  ;;  %p94_p13 = scmp.lt.s32.totalorder %s88_s3, %s88_s3 }
  0x1c   :  { %p95_p0 = por %p94_p13, %p93_p12 }
  0x1e   :  { %p96_p1 = pnand %p95_p0, %p89_p11 }
  0x20   :  { %99 = shalt.err (!%p96_p1)
}
  0x21   :  { %s106_s0 = smov 128   ;;  %s107_s4 = smov 8  }
  0x22   :  { %30 = dma.hbm_to_vmem [thread:$0]  %s167_s1, 256, %s123_s12, [#allocation5], %s106_s0, %s106_s0, %s107_s4  }
  0x23   :  { %100 = dma.done.wait [#allocation3], 16  }
  0x24   :  { %101 = vsyncadd [#allocation3], 4294967280 }
  0x25   :  { %102 = dma.done.wait [#allocation5], 256  }
  0x26   :  { %103 = vsyncadd [#allocation5], 4294967040  ;;  %vm38_vm0 = vcmask 253952   ;;  %vm43_vm1 = vcmask 261120   ;;  %v37_v0 = vld [vmem:[#allocation2] sm:$0x1] }
  0x27   :  { %v41_v1 = vld [vmem:[#allocation4] sm:$0xff]  ;;  %v42_v2 = vld [vmem:[#allocation4 + $0x8] sm:$0xff]  ;;  %39 = vst.msk [vmem:[%s168_s2] sm:$0x1] %vm38_vm0, %v37_v0  ;;  %40 = vst.msk [vmem:[%s168_s2 + $0x10] sm:$0x1] %vm38_vm0, %v37_v0 }
  0x28   :  { %44 = vst.msk [vmem:[%s168_s2 + $0x1] sm:$0xff] %vm43_vm1, %v41_v1  ;;  %45 = vst.msk [vmem:[%s168_s2 + $0x11] sm:$0xff] %vm43_vm1, %v42_v2 }
  0x29   :  { %50 = vsyncpa [#allocation3], 1 }
  0x2a   :  { %51 = vsyncpa [#allocation5], 1 }

</bundles_post_ra>
